<compile_context>
chip_gen: v5e
topology: v5e:2x2
jax: 0.10.0
libtpu: 0.0.40
codegen_flags: <defaults>
</compile_context>

<pallas_src>
import functools

import jax
import jax.numpy as jnp
from jax import lax
from jax.experimental import pallas as pl
from jax.experimental.pallas import tpu as pltpu


def _attention_core(h, d_k, approx_recip, q, k, v, wo_ref, bo_ref, out_ref):
    """Head-batched attention + output projection.

    q: (TQ, D), k/v: (S, D) — already projected, in the compute dtype.
    """
    # Split heads along the feature axis and stack them on a new *leading*
    # (batch) axis -> (h, rows, d_k).  Leading-axis stacking keeps the lane
    # dim intact (no risky minor-dim transposes inside the kernel).
    def split_heads(x):
        return jnp.stack([x[:, i * d_k:(i + 1) * d_k] for i in range(h)], axis=0)

    qh = split_heads(q)          # (h, TQ, d_k)
    kh = split_heads(k)          # (h, S,  d_k)
    vh = split_heads(v)          # (h, S,  d_k)

    # scores = q @ k^T per head, as ONE batched dot_general (no explicit .T;
    # no 1/sqrt(d_k) scaling, per the reference code).
    scores = lax.dot_general(
        qh, kh,
        dimension_numbers=(((2,), (2,)), ((0,), (0,))),
        preferred_element_type=jnp.float32)                       # (h, TQ, S)

    # Numerically stable softmax; the 1/denom is folded into a single rescale
    # of the context (flash-style) so the (h, TQ, S) prob matrix is never
    # multiplied elementwise by the reciprocal.
    m = jnp.max(scores, axis=-1, keepdims=True)
    e = jnp.exp(scores - m)                                       # f32
    denom = jnp.sum(e, axis=-1, keepdims=True)                    # (h, TQ, 1)

    ctx = lax.dot_general(
        e.astype(vh.dtype), vh,
        dimension_numbers=(((2,), (1,)), ((0,), (0,))),
        preferred_element_type=jnp.float32)                       # (h, TQ, d_k)
    ctx = ctx * pl.reciprocal(denom, approx=approx_recip)

    # transpose(1,2).view(-1, h*d_k) == concat heads along the feature axis.
    # A single (TQ, D) @ (D, D) output matmul keeps the MXU contraction wide.
    ctx_flat = jnp.concatenate([ctx[i] for i in range(h)], axis=-1)   # (TQ, D)

    out = jnp.dot(ctx_flat.astype(wo_ref.dtype), wo_ref[...],
                  preferred_element_type=jnp.float32) + bo_ref[...]
    out_ref[...] = out.astype(out_ref.dtype)


def _mha_general_kernel(h, d_k, approx_recip,
                        xq_ref, xk_ref, xv_ref,
                        wq_ref, bq_ref, wk_ref, bk_ref, wv_ref, bv_ref,
                        wo_ref, bo_ref, out_ref, k_scratch, v_scratch):
    """One grid step == (batch element, query tile). q / k / v inputs distinct.

    K/V projections are shared by every query tile of a batch element, so they
    are computed once (qi == 0) into persistent VMEM scratch and reused.
    """
    x_dtype = xq_ref.dtype

    @pl.when(pl.program_id(1) == 0)
    def _():
        k_scratch[...] = (jnp.dot(xk_ref[...], wk_ref[...],
                                  preferred_element_type=jnp.float32)
                          + bk_ref[...]).astype(x_dtype)          # (S, D)
        v_scratch[...] = (jnp.dot(xv_ref[...], wv_ref[...],
                                  preferred_element_type=jnp.float32)
                          + bv_ref[...]).astype(x_dtype)          # (S, D)

    q = (jnp.dot(xq_ref[...], wq_ref[...], preferred_element_type=jnp.float32)
         + bq_ref[...]).astype(x_dtype)                            # (TQ, D)
    _attention_core(h, d_k, approx_recip, q, k_scratch[...], v_scratch[...],
                    wo_ref, bo_ref, out_ref)


def _mha_selfattn_kernel(h, d_k, approx_recip,
                         x_ref, wqkv_ref, bqkv_ref, wo_ref, bo_ref, out_ref):
    """Self-attention fast path (query is key is value): fused QKV projection."""
    D = h * d_k
    x_dtype = x_ref.dtype
    qkv = (jnp.dot(x_ref[...], wqkv_ref[...], preferred_element_type=jnp.float32)
           + bqkv_ref[...]).astype(x_dtype)                        # (S, 3D)
    q = qkv[:, 0 * D:1 * D]
    k = qkv[:, 1 * D:2 * D]
    v = qkv[:, 2 * D:3 * D]
    _attention_core(h, d_k, approx_recip, q, k, v, wo_ref, bo_ref, out_ref)


def multi_headed_attention(query, key, value, params, *, h, tq=128):
    """params: dict with wq,bq,wk,bk,wv,bv,wo,bo (weights in torch (out,in) layout)."""
    B, S, D = query.shape
    assert D % h == 0
    d_k = D // h
    dtype = query.dtype
    approx_recip = (dtype == jnp.bfloat16)   # exact reciprocal for f32 inputs

    # Glue: pre-transpose weights to (in, out) so the kernel does x @ W_t + b.
    wq_t, wk_t, wv_t, wo_t = (params[n].T for n in ("wq", "wk", "wv", "wo"))
    bq, bk, bv, bo = (params[n].reshape(1, D) for n in ("bq", "bk", "bv", "bo"))

    itemsize = jnp.dtype(dtype).itemsize
    cost = pl.CostEstimate(
        flops=4 * 2 * B * S * D * D + 2 * 2 * B * h * S * S * d_k,
        transcendentals=B * h * S * S,
        bytes_accessed=itemsize * (4 * B * S * D + 4 * (D * D + D)),
    )
    vmem_limit = 32 * 1024 * 1024   # fits the 64 MiB v7x budget with headroom

    # Fused self-attention path only when the whole sequence fits comfortably
    # in VMEM (f32 score block + activations), else use the tiled general path.
    fused_bytes = 4 * h * S * S + itemsize * S * (3 * D + 2 * D)
    if (query is key) and (key is value) and fused_bytes <= (8 << 20):
        # Self-attention: fuse the three projections into one (D, 3D) matmul.
        wqkv = jnp.concatenate([wq_t, wk_t, wv_t], axis=1)         # (D, 3D)
        bqkv = jnp.concatenate([bq, bk, bv], axis=1)               # (1, 3D)
        kernel = functools.partial(_mha_selfattn_kernel, h, d_k, approx_recip)
        out = pl.pallas_call(
            kernel,
            out_shape=jax.ShapeDtypeStruct((B, S, D), dtype),
            grid_spec=pltpu.PrefetchScalarGridSpec(
                num_scalar_prefetch=0,
                grid=(B,),
                in_specs=[
                    pl.BlockSpec((None, S, D), lambda b: (b, 0, 0)),
                    pl.BlockSpec((D, 3 * D), lambda b: (0, 0)),
                    pl.BlockSpec((1, 3 * D), lambda b: (0, 0)),
                    pl.BlockSpec((D, D), lambda b: (0, 0)),
                    pl.BlockSpec((1, D), lambda b: (0, 0)),
                ],
                out_specs=pl.BlockSpec((None, S, D), lambda b: (b, 0, 0)),
            ),
            compiler_params=pltpu.CompilerParams(
                dimension_semantics=("parallel",),
                vmem_limit_bytes=vmem_limit),
            cost_estimate=cost,
        )(query, wqkv, bqkv, wo_t, bo)
        return out, 0

    # General (cross-attention style) path: tile the query sequence axis so
    # the live score tile is (h, TQ, S) and the pipeline has (B * NQ) steps.
    TQ = S if (S <= tq or S % tq != 0) else tq
    NQ = S // TQ

    q_spec = pl.BlockSpec((None, TQ, D), lambda b, qi: (b, qi, 0))
    kv_spec = pl.BlockSpec((None, S, D), lambda b, qi: (b, 0, 0))
    w_spec = pl.BlockSpec((D, D), lambda b, qi: (0, 0))
    b_spec = pl.BlockSpec((1, D), lambda b, qi: (0, 0))

    kernel = functools.partial(_mha_general_kernel, h, d_k, approx_recip)
    out = pl.pallas_call(
        kernel,
        out_shape=jax.ShapeDtypeStruct((B, S, D), dtype),
        grid_spec=pltpu.PrefetchScalarGridSpec(
            num_scalar_prefetch=0,
            grid=(B, NQ),
            in_specs=[q_spec, kv_spec, kv_spec,
                      w_spec, b_spec, w_spec, b_spec, w_spec, b_spec,
                      w_spec, b_spec],
            out_specs=pl.BlockSpec((None, TQ, D), lambda b, qi: (b, qi, 0)),
            scratch_shapes=[pltpu.VMEM((S, D), dtype),     # projected K
                            pltpu.VMEM((S, D), dtype)],    # projected V
        ),
        compiler_params=pltpu.CompilerParams(
            # qi axis is "arbitrary": the K/V scratch carry requires the
            # sequential qi=0..NQ-1 order within each batch element.
            dimension_semantics=("parallel", "arbitrary"),
            vmem_limit_bytes=vmem_limit),
        cost_estimate=cost,
    )(query, key, value, wq_t, bq, wk_t, bk, wv_t, bv, wo_t, bo)

    loss = 0  # reference attention() always returns loss = 0
    return out, loss


def _reference(query, key, value, params, *, h):
    """Pure-JAX reference mirroring the PyTorch forward."""
    B, S, D = query.shape
    d_k = D // h

    def lin(x, w, b):
        return x @ w.T + b

    q = lin(query, params["wq"], params["bq"]).reshape(B, S, h, d_k).transpose(0, 2, 1, 3)
    k = lin(key,   params["wk"], params["bk"]).reshape(B, S, h, d_k).transpose(0, 2, 1, 3)
    v = lin(value, params["wv"], params["bv"]).reshape(B, S, h, d_k).transpose(0, 2, 1, 3)

    scores = jnp.einsum("bhqd,bhkd->bhqk", q, k)           # no scaling
    p = jax.nn.softmax(scores, axis=-1)
    ctx = jnp.einsum("bhqk,bhkd->bhqd", p, v)
    ctx = ctx.transpose(0, 2, 1, 3).reshape(B, S, D)
    return lin(ctx, params["wo"], params["bo"])


def _make_params(key0, D):
    ks = jax.random.split(key0, 8)
    bound = 1.0 / jnp.sqrt(D)  # torch.nn.Linear default uniform bound

    def u(k, shape):
        return jax.random.uniform(k, shape, jnp.float32, -bound, bound)

    return {
        "wq": u(ks[0], (D, D)), "bq": u(ks[1], (D,)),
        "wk": u(ks[2], (D, D)), "bk": u(ks[3], (D,)),
        "wv": u(ks[4], (D, D)), "bv": u(ks[5], (D,)),
        "wo": u(ks[6], (D, D)), "bo": u(ks[7], (D,)),
    }


if __name__ == "__main__":
    key0 = jax.random.PRNGKey(0)
    kp, k1, k2, k3, k4, k5 = jax.random.split(key0, 6)

    # --- small config matching the module defaults: batch=2, seq=8, d_model=32, heads=4
    B, S, D, H = 2, 8, 32, 4
    params = _make_params(kp, D)

    query = jax.random.normal(k1, (B, S, D), jnp.float32)
    key_x = jax.random.normal(k2, (B, S, D), jnp.float32)
    value = jax.random.normal(k3, (B, S, D), jnp.float32)

    # General path: distinct query / key / value.
    out, loss = multi_headed_attention(query, key_x, value, params, h=H)
    out = jax.block_until_ready(out)
    ref = _reference(query, key_x, value, params, h=H)
    assert out.shape == (B, S, D)
    assert jnp.allclose(out, ref, atol=1e-3, rtol=1e-3), "general path mismatch"
    assert loss == 0

    # Fused self-attention fast path: query is key is value.
    x_same = jax.random.normal(k4, (B, S, D), jnp.float32)
    out_sa, loss_sa = multi_headed_attention(x_same, x_same, x_same, params, h=H)
    out_sa = jax.block_until_ready(out_sa)
    ref_sa = _reference(x_same, x_same, x_same, params, h=H)
    assert jnp.allclose(out_sa, ref_sa, atol=1e-3, rtol=1e-3), "self-attn path mismatch"
    assert loss_sa == 0

    # Tiled general path (NQ > 1): exercises the per-batch K/V scratch carry.
    S2 = 256
    q2 = jax.random.normal(k5, (B, S2, D), jnp.float32)
    k2_x = jax.random.normal(k1, (B, S2, D), jnp.float32)
    v2 = jax.random.normal(k2, (B, S2, D), jnp.float32)
    out2, loss2 = multi_headed_attention(q2, k2_x, v2, params, h=H, tq=128)
    out2 = jax.block_until_ready(out2)
    ref2 = _reference(q2, k2_x, v2, params, h=H)
    assert out2.shape == (B, S2, D)
    assert jnp.allclose(out2, ref2, atol=1e-2, rtol=1e-2), "tiled path mismatch"
    assert loss2 == 0

    print("KERNEL_OK")
</pallas_src>

<mosaic_0001>
module attributes {stable_mosaic.version = 11 : i64} {
  func.func @_mha_general_kernel(%arg0: i32, %arg1: i32, %arg2: memref<1x8x32xf32, #tpu.memory_space<vmem>>, %arg3: memref<1x8x32xf32, #tpu.memory_space<vmem>>, %arg4: memref<1x8x32xf32, #tpu.memory_space<vmem>>, %arg5: memref<32x32xf32, #tpu.memory_space<vmem>>, %arg6: memref<1x32xf32, #tpu.memory_space<vmem>>, %arg7: memref<32x32xf32, #tpu.memory_space<vmem>>, %arg8: memref<1x32xf32, #tpu.memory_space<vmem>>, %arg9: memref<32x32xf32, #tpu.memory_space<vmem>>, %arg10: memref<1x32xf32, #tpu.memory_space<vmem>>, %arg11: memref<32x32xf32, #tpu.memory_space<vmem>>, %arg12: memref<1x32xf32, #tpu.memory_space<vmem>>, %arg13: memref<1x8x32xf32, #tpu.memory_space<vmem>>, %arg14: memref<8x32xf32, #tpu.memory_space<vmem>>, %arg15: memref<8x32xf32, #tpu.memory_space<vmem>>) attributes {dimension_semantics = [#tpu.dimension_semantics<parallel>, #tpu.dimension_semantics<arbitrary>], iteration_bounds = array<i64: 2, 1>, scalar_prefetch = 0 : i64, scratch_operands = 2 : i64, tpu.core_type = #tpu.core_type<tc>, window_params = [{transform_indices = @transform_0, window_bounds = array<i64: 1, 8, 32>}, {transform_indices = @transform_1, window_bounds = array<i64: 1, 8, 32>}, {transform_indices = @transform_2, window_bounds = array<i64: 1, 8, 32>}, {pipeline_mode = #tpu.pipeline_mode<synchronous>, transform_indices = @transform_3, window_bounds = array<i64: 32, 32>}, {pipeline_mode = #tpu.pipeline_mode<synchronous>, transform_indices = @transform_4, window_bounds = array<i64: 1, 32>}, {pipeline_mode = #tpu.pipeline_mode<synchronous>, transform_indices = @transform_5, window_bounds = array<i64: 32, 32>}, {pipeline_mode = #tpu.pipeline_mode<synchronous>, transform_indices = @transform_6, window_bounds = array<i64: 1, 32>}, {pipeline_mode = #tpu.pipeline_mode<synchronous>, transform_indices = @transform_7, window_bounds = array<i64: 32, 32>}, {pipeline_mode = #tpu.pipeline_mode<synchronous>, transform_indices = @transform_8, window_bounds = array<i64: 1, 32>}, {pipeline_mode = #tpu.pipeline_mode<synchronous>, transform_indices = @transform_9, window_bounds = array<i64: 32, 32>}, {pipeline_mode = #tpu.pipeline_mode<synchronous>, transform_indices = @transform_10, window_bounds = array<i64: 1, 32>}, {transform_indices = @transform_11, window_bounds = array<i64: 1, 8, 32>}]} {
    %c0_i32 = arith.constant 0 : i32
    %0 = arith.cmpi eq, %arg1, %c0_i32 : i32
    %1 = arith.extui %0 : i1 to i32
    %c0_i32_0 = arith.constant 0 : i32
    %2 = arith.cmpi ne, %1, %c0_i32_0 : i32
    scf.if %2 {
      %c0_23 = arith.constant 0 : index
      %c0_24 = arith.constant 0 : index
      %c0_25 = arith.constant 0 : index
      %68 = vector.load %arg3[%c0_23, %c0_24, %c0_25] : memref<1x8x32xf32, #tpu.memory_space<vmem>>, vector<1x8x32xf32>
      %69 = vector.shape_cast %68 : vector<1x8x32xf32> to vector<8x32xf32>
      %c0_26 = arith.constant 0 : index
      %c0_27 = arith.constant 0 : index
      %70 = vector.load %arg7[%c0_26, %c0_27] : memref<32x32xf32, #tpu.memory_space<vmem>>, vector<32x32xf32>
      %cst_28 = arith.constant dense<0.000000e+00> : vector<8x32xf32>
      %71 = tpu.matmul %69, %70, %cst_28 {dimension_numbers = #tpu.dot_dimension_numbers<[1], [0], [0], [1], [0, 0, 1, 1], [], []>} : vector<8x32xf32>, vector<32x32xf32>, vector<8x32xf32> -> vector<8x32xf32>
      %c0_29 = arith.constant 0 : index
      %c0_30 = arith.constant 0 : index
      %72 = vector.load %arg8[%c0_29, %c0_30] : memref<1x32xf32, #tpu.memory_space<vmem>>, vector<1x32xf32>
      %73 = vector.broadcast %72 : vector<1x32xf32> to vector<8x32xf32>
      %74 = arith.addf %71, %73 : vector<8x32xf32>
      %c0_31 = arith.constant 0 : index
      %c0_32 = arith.constant 0 : index
      %75 = vector.load %arg14[%c0_31, %c0_32] : memref<8x32xf32, #tpu.memory_space<vmem>>, vector<8x32xf32>
      tpu.vector_store %arg14[%c0_31, %c0_32], %74 {strides = array<i32>} : memref<8x32xf32, #tpu.memory_space<vmem>>, vector<8x32xf32>,
      %c0_33 = arith.constant 0 : index
      %c0_34 = arith.constant 0 : index
      %c0_35 = arith.constant 0 : index
      %76 = vector.load %arg4[%c0_33, %c0_34, %c0_35] : memref<1x8x32xf32, #tpu.memory_space<vmem>>, vector<1x8x32xf32>
      %77 = vector.shape_cast %76 : vector<1x8x32xf32> to vector<8x32xf32>
      %c0_36 = arith.constant 0 : index
      %c0_37 = arith.constant 0 : index
      %78 = vector.load %arg9[%c0_36, %c0_37] : memref<32x32xf32, #tpu.memory_space<vmem>>, vector<32x32xf32>
      %cst_38 = arith.constant dense<0.000000e+00> : vector<8x32xf32>
      %79 = tpu.matmul %77, %78, %cst_38 {dimension_numbers = #tpu.dot_dimension_numbers<[1], [0], [0], [1], [0, 0, 1, 1], [], []>} : vector<8x32xf32>, vector<32x32xf32>, vector<8x32xf32> -> vector<8x32xf32>
      %c0_39 = arith.constant 0 : index
      %c0_40 = arith.constant 0 : index
      %80 = vector.load %arg10[%c0_39, %c0_40] : memref<1x32xf32, #tpu.memory_space<vmem>>, vector<1x32xf32>
      %81 = vector.broadcast %80 : vector<1x32xf32> to vector<8x32xf32>
      %82 = arith.addf %79, %81 : vector<8x32xf32>
      %c0_41 = arith.constant 0 : index
      %c0_42 = arith.constant 0 : index
      %83 = vector.load %arg15[%c0_41, %c0_42] : memref<8x32xf32, #tpu.memory_space<vmem>>, vector<8x32xf32>
      tpu.vector_store %arg15[%c0_41, %c0_42], %82 {strides = array<i32>} : memref<8x32xf32, #tpu.memory_space<vmem>>, vector<8x32xf32>,
    } else {
    }
    %c0 = arith.constant 0 : index
    %c0_1 = arith.constant 0 : index
    %c0_2 = arith.constant 0 : index
    %3 = vector.load %arg2[%c0, %c0_1, %c0_2] : memref<1x8x32xf32, #tpu.memory_space<vmem>>, vector<1x8x32xf32>
    %4 = vector.shape_cast %3 : vector<1x8x32xf32> to vector<8x32xf32>
    %c0_3 = arith.constant 0 : index
    %c0_4 = arith.constant 0 : index
    %5 = vector.load %arg5[%c0_3, %c0_4] : memref<32x32xf32, #tpu.memory_space<vmem>>, vector<32x32xf32>
    %cst = arith.constant dense<0.000000e+00> : vector<8x32xf32>
    %6 = tpu.matmul %4, %5, %cst {dimension_numbers = #tpu.dot_dimension_numbers<[1], [0], [0], [1], [0, 0, 1, 1], [], []>} : vector<8x32xf32>, vector<32x32xf32>, vector<8x32xf32> -> vector<8x32xf32>
    %c0_5 = arith.constant 0 : index
    %c0_6 = arith.constant 0 : index
    %7 = vector.load %arg6[%c0_5, %c0_6] : memref<1x32xf32, #tpu.memory_space<vmem>>, vector<1x32xf32>
    %8 = vector.broadcast %7 : vector<1x32xf32> to vector<8x32xf32>
    %9 = arith.addf %6, %8 : vector<8x32xf32>
    %c0_7 = arith.constant 0 : index
    %c0_8 = arith.constant 0 : index
    %10 = vector.load %arg14[%c0_7, %c0_8] : memref<8x32xf32, #tpu.memory_space<vmem>>, vector<8x32xf32>
    %c0_9 = arith.constant 0 : index
    %c0_10 = arith.constant 0 : index
    %11 = vector.load %arg15[%c0_9, %c0_10] : memref<8x32xf32, #tpu.memory_space<vmem>>, vector<8x32xf32>
    %12 = vector.extract_strided_slice %9 {offsets = [0, 0], sizes = [8, 8], strides = [1, 1]} : vector<8x32xf32> to vector<8x8xf32>
    %13 = vector.extract_strided_slice %9 {offsets = [0, 8], sizes = [8, 8], strides = [1, 1]} : vector<8x32xf32> to vector<8x8xf32>
    %14 = vector.extract_strided_slice %9 {offsets = [0, 16], sizes = [8, 8], strides = [1, 1]} : vector<8x32xf32> to vector<8x8xf32>
    %15 = vector.extract_strided_slice %9 {offsets = [0, 24], sizes = [8, 8], strides = [1, 1]} : vector<8x32xf32> to vector<8x8xf32>
    %16 = vector.shape_cast %12 : vector<8x8xf32> to vector<1x8x8xf32>
    %17 = vector.shape_cast %13 : vector<8x8xf32> to vector<1x8x8xf32>
    %18 = vector.shape_cast %14 : vector<8x8xf32> to vector<1x8x8xf32>
    %19 = vector.shape_cast %15 : vector<8x8xf32> to vector<1x8x8xf32>
    %20 = tpu.concatenate %16, %17, %18, %19 in 0 : vector<1x8x8xf32>, vector<1x8x8xf32>, vector<1x8x8xf32>, vector<1x8x8xf32> -> vector<4x8x8xf32>
    %21 = vector.extract_strided_slice %10 {offsets = [0, 0], sizes = [8, 8], strides = [1, 1]} : vector<8x32xf32> to vector<8x8xf32>
    %22 = vector.extract_strided_slice %10 {offsets = [0, 8], sizes = [8, 8], strides = [1, 1]} : vector<8x32xf32> to vector<8x8xf32>
    %23 = vector.extract_strided_slice %10 {offsets = [0, 16], sizes = [8, 8], strides = [1, 1]} : vector<8x32xf32> to vector<8x8xf32>
    %24 = vector.extract_strided_slice %10 {offsets = [0, 24], sizes = [8, 8], strides = [1, 1]} : vector<8x32xf32> to vector<8x8xf32>
    %25 = vector.shape_cast %21 : vector<8x8xf32> to vector<1x8x8xf32>
    %26 = vector.shape_cast %22 : vector<8x8xf32> to vector<1x8x8xf32>
    %27 = vector.shape_cast %23 : vector<8x8xf32> to vector<1x8x8xf32>
    %28 = vector.shape_cast %24 : vector<8x8xf32> to vector<1x8x8xf32>
    %29 = tpu.concatenate %25, %26, %27, %28 in 0 : vector<1x8x8xf32>, vector<1x8x8xf32>, vector<1x8x8xf32>, vector<1x8x8xf32> -> vector<4x8x8xf32>
    %30 = vector.extract_strided_slice %11 {offsets = [0, 0], sizes = [8, 8], strides = [1, 1]} : vector<8x32xf32> to vector<8x8xf32>
    %31 = vector.extract_strided_slice %11 {offsets = [0, 8], sizes = [8, 8], strides = [1, 1]} : vector<8x32xf32> to vector<8x8xf32>
    %32 = vector.extract_strided_slice %11 {offsets = [0, 16], sizes = [8, 8], strides = [1, 1]} : vector<8x32xf32> to vector<8x8xf32>
    %33 = vector.extract_strided_slice %11 {offsets = [0, 24], sizes = [8, 8], strides = [1, 1]} : vector<8x32xf32> to vector<8x8xf32>
    %34 = vector.shape_cast %30 : vector<8x8xf32> to vector<1x8x8xf32>
    %35 = vector.shape_cast %31 : vector<8x8xf32> to vector<1x8x8xf32>
    %36 = vector.shape_cast %32 : vector<8x8xf32> to vector<1x8x8xf32>
    %37 = vector.shape_cast %33 : vector<8x8xf32> to vector<1x8x8xf32>
    %38 = tpu.concatenate %34, %35, %36, %37 in 0 : vector<1x8x8xf32>, vector<1x8x8xf32>, vector<1x8x8xf32>, vector<1x8x8xf32> -> vector<4x8x8xf32>
    %cst_11 = arith.constant dense<0.000000e+00> : vector<4x8x8xf32>
    %39 = tpu.matmul %20, %29, %cst_11 {dimension_numbers = #tpu.dot_dimension_numbers<[2], [2], [1], [1], [0, 0, 0, 1, 1, 1], [0], [0]>} : vector<4x8x8xf32>, vector<4x8x8xf32>, vector<4x8x8xf32> -> vector<4x8x8xf32>
    %cst_12 = arith.constant dense<0xFF800000> : vector<4x8xf32>
    %40 = vector.multi_reduction <maximumf>, %39, %cst_12 [2] : vector<4x8x8xf32> to vector<4x8xf32>
    %41 = vector.shape_cast %40 : vector<4x8xf32> to vector<4x8x1xf32>
    %42 = vector.broadcast %41 : vector<4x8x1xf32> to vector<4x8x8xf32>
    %43 = arith.subf %39, %42 : vector<4x8x8xf32>
    %44 = math.exp %43 : vector<4x8x8xf32>
    %cst_13 = arith.constant dense<0.000000e+00> : vector<4x8xf32>
    %45 = vector.multi_reduction <add>, %44, %cst_13 [2] : vector<4x8x8xf32> to vector<4x8xf32>
    %46 = vector.shape_cast %45 : vector<4x8xf32> to vector<4x8x1xf32>
    %cst_14 = arith.constant dense<0.000000e+00> : vector<4x8x8xf32>
    %47 = tpu.matmul %44, %38, %cst_14 {dimension_numbers = #tpu.dot_dimension_numbers<[2], [1], [1], [2], [0, 0, 0, 1, 1, 2], [0], [0]>} : vector<4x8x8xf32>, vector<4x8x8xf32>, vector<4x8x8xf32> -> vector<4x8x8xf32>
    %48 = tpu.reciprocal %46 : vector<4x8x1xf32> -> vector<4x8x1xf32>
    %49 = vector.broadcast %48 : vector<4x8x1xf32> to vector<4x8x8xf32>
    %50 = arith.mulf %47, %49 : vector<4x8x8xf32>
    %51 = vector.extract_strided_slice %50 {offsets = [0, 0, 0], sizes = [1, 8, 8], strides = [1, 1, 1]} : vector<4x8x8xf32> to vector<1x8x8xf32>
    %52 = vector.shape_cast %51 : vector<1x8x8xf32> to vector<8x8xf32>
    %53 = vector.extract_strided_slice %50 {offsets = [1, 0, 0], sizes = [1, 8, 8], strides = [1, 1, 1]} : vector<4x8x8xf32> to vector<1x8x8xf32>
    %54 = vector.shape_cast %53 : vector<1x8x8xf32> to vector<8x8xf32>
    %55 = vector.extract_strided_slice %50 {offsets = [2, 0, 0], sizes = [1, 8, 8], strides = [1, 1, 1]} : vector<4x8x8xf32> to vector<1x8x8xf32>
    %56 = vector.shape_cast %55 : vector<1x8x8xf32> to vector<8x8xf32>
    %57 = vector.extract_strided_slice %50 {offsets = [3, 0, 0], sizes = [1, 8, 8], strides = [1, 1, 1]} : vector<4x8x8xf32> to vector<1x8x8xf32>
    %58 = vector.shape_cast %57 : vector<1x8x8xf32> to vector<8x8xf32>
    %59 = tpu.concatenate %52, %54, %56, %58 in 1 : vector<8x8xf32>, vector<8x8xf32>, vector<8x8xf32>, vector<8x8xf32> -> vector<8x32xf32>
    %c0_15 = arith.constant 0 : index
    %c0_16 = arith.constant 0 : index
    %60 = vector.load %arg11[%c0_15, %c0_16] : memref<32x32xf32, #tpu.memory_space<vmem>>, vector<32x32xf32>
    %cst_17 = arith.constant dense<0.000000e+00> : vector<8x32xf32>
    %61 = tpu.matmul %59, %60, %cst_17 {dimension_numbers = #tpu.dot_dimension_numbers<[1], [0], [0], [1], [0, 0, 1, 1], [], []>} : vector<8x32xf32>, vector<32x32xf32>, vector<8x32xf32> -> vector<8x32xf32>
    %c0_18 = arith.constant 0 : index
    %c0_19 = arith.constant 0 : index
    %62 = vector.load %arg12[%c0_18, %c0_19] : memref<1x32xf32, #tpu.memory_space<vmem>>, vector<1x32xf32>
    %63 = vector.broadcast %62 : vector<1x32xf32> to vector<8x32xf32>
    %64 = arith.addf %61, %63 : vector<8x32xf32>
    %c0_20 = arith.constant 0 : index
    %c0_21 = arith.constant 0 : index
    %c0_22 = arith.constant 0 : index
    %65 = vector.load %arg13[%c0_20, %c0_21, %c0_22] : memref<1x8x32xf32, #tpu.memory_space<vmem>>, vector<1x8x32xf32>
    %66 = vector.shape_cast %65 : vector<1x8x32xf32> to vector<8x32xf32>
    %67 = vector.shape_cast %64 : vector<8x32xf32> to vector<1x8x32xf32>
    tpu.vector_store %arg13[%c0_20, %c0_21, %c0_22], %67 {strides = array<i32>} : memref<1x8x32xf32, #tpu.memory_space<vmem>>, vector<1x8x32xf32>,
    return
  }
  func.func @transform_0(%arg0: i32, %arg1: i32) -> (i32, i32, i32) {
    %c0_i32 = arith.constant 0 : i32
    %c0_i32_0 = arith.constant 0 : i32
    return %arg0, %arg1, %c0_i32 : i32, i32, i32
  }
  func.func @transform_1(%arg0: i32, %arg1: i32) -> (i32, i32, i32) {
    %c0_i32 = arith.constant 0 : i32
    %c0_i32_0 = arith.constant 0 : i32
    %c0_i32_1 = arith.constant 0 : i32
    return %arg0, %c0_i32, %c0_i32_0 : i32, i32, i32
  }
  func.func @transform_2(%arg0: i32, %arg1: i32) -> (i32, i32, i32) {
    %c0_i32 = arith.constant 0 : i32
    %c0_i32_0 = arith.constant 0 : i32
    %c0_i32_1 = arith.constant 0 : i32
    return %arg0, %c0_i32, %c0_i32_0 : i32, i32, i32
  }
  func.func @transform_3(%arg0: i32, %arg1: i32) -> (i32, i32) {
    %c0_i32 = arith.constant 0 : i32
    %c0_i32_0 = arith.constant 0 : i32
    %c0_i32_1 = arith.constant 0 : i32
    return %c0_i32, %c0_i32_0 : i32, i32
  }
  func.func @transform_4(%arg0: i32, %arg1: i32) -> (i32, i32) {
    %c0_i32 = arith.constant 0 : i32
    %c0_i32_0 = arith.constant 0 : i32
    %c0_i32_1 = arith.constant 0 : i32
    return %c0_i32, %c0_i32_0 : i32, i32
  }
  func.func @transform_5(%arg0: i32, %arg1: i32) -> (i32, i32) {
    %c0_i32 = arith.constant 0 : i32
    %c0_i32_0 = arith.constant 0 : i32
    %c0_i32_1 = arith.constant 0 : i32
    return %c0_i32, %c0_i32_0 : i32, i32
  }
  func.func @transform_6(%arg0: i32, %arg1: i32) -> (i32, i32) {
    %c0_i32 = arith.constant 0 : i32
    %c0_i32_0 = arith.constant 0 : i32
    %c0_i32_1 = arith.constant 0 : i32
    return %c0_i32, %c0_i32_0 : i32, i32
  }
  func.func @transform_7(%arg0: i32, %arg1: i32) -> (i32, i32) {
    %c0_i32 = arith.constant 0 : i32
    %c0_i32_0 = arith.constant 0 : i32
    %c0_i32_1 = arith.constant 0 : i32
    return %c0_i32, %c0_i32_0 : i32, i32
  }
  func.func @transform_8(%arg0: i32, %arg1: i32) -> (i32, i32) {
    %c0_i32 = arith.constant 0 : i32
    %c0_i32_0 = arith.constant 0 : i32
    %c0_i32_1 = arith.constant 0 : i32
    return %c0_i32, %c0_i32_0 : i32, i32
  }
  func.func @transform_9(%arg0: i32, %arg1: i32) -> (i32, i32) {
    %c0_i32 = arith.constant 0 : i32
    %c0_i32_0 = arith.constant 0 : i32
    %c0_i32_1 = arith.constant 0 : i32
    return %c0_i32, %c0_i32_0 : i32, i32
  }
  func.func @transform_10(%arg0: i32, %arg1: i32) -> (i32, i32) {
    %c0_i32 = arith.constant 0 : i32
    %c0_i32_0 = arith.constant 0 : i32
    %c0_i32_1 = arith.constant 0 : i32
    return %c0_i32, %c0_i32_0 : i32, i32
  }
  func.func @transform_11(%arg0: i32, %arg1: i32) -> (i32, i32, i32) {
    %c0_i32 = arith.constant 0 : i32
    %c0_i32_0 = arith.constant 0 : i32
    return %arg0, %arg1, %c0_i32 : i32, i32, i32
  }
}

</mosaic_0001>

<bundles_post_ra>
// kernel: tpu_custom_call.1
= control target key start
LH: loop header
LB: loop body
LE: loop exit
PB: predicated region body
PF: predicated region fallthrough
CT: control target
= control target key end

     0   :  { %s2046_s0 = inlined_call_operand.hbm [shape: f32[2,8,32], index: 0, kind: input, shape index: {}]   ;;  %s2047_s1 = inlined_call_operand.hbm [shape: f32[2,8,32], index: 1, kind: input, shape index: {}]   ;;  %s2048_s2 = inlined_call_operand.hbm [shape: f32[2,8,32], index: 2, kind: input, shape index: {}]   ;;  %s2049_s3 = inlined_call_operand.hbm [shape: f32[32,32], index: 3, kind: input, shape index: {}]   ;;  %s2050_s4 = inlined_call_operand.vmem [shape: f32[1,32], index: 4, kind: input, shape index: {}]   ;;  %s2051_s5 = inlined_call_operand.hbm [shape: f32[32,32], index: 5, kind: input, shape index: {}]   ;;  %s2052_s6 = inlined_call_operand.vmem [shape: f32[1,32], index: 6, kind: input, shape index: {}]   ;;  %s2053_s7 = inlined_call_operand.hbm [shape: f32[32,32], index: 7, kind: input, shape index: {}]   ;;  %s2054_s8 = inlined_call_operand.vmem [shape: f32[1,32], index: 8, kind: input, shape index: {}]   ;;  %s2055_s9 = inlined_call_operand.hbm [shape: f32[32,32], index: 9, kind: input, shape index: {}]   ;;  %s2056_s10 = inlined_call_operand.vmem [shape: f32[1,32], index: 10, kind: input, shape index: {}]   ;;  %s2057_s11 = inlined_call_operand.hbm [shape: f32[2,8,32], index: 11, kind: output, shape index: {}]  }
   0x1   :  { %2071 = sst [smem:[#allocation29_spill]] %s2046_s0 }
   0x2   :  { %2072 = sst [smem:[#allocation30_spill]] %s2047_s1 }
   0x3   :  { %2073 = sst [smem:[#allocation31_spill]] %s2049_s3 }
   0x4   :  { %2074 = sst [smem:[#allocation32_spill]] %s2051_s5 }
   0x5   :  { %2075 = sst [smem:[#allocation33_spill]] %s2053_s7 }
   0x6   :  { %2076 = sst [smem:[#allocation34_spill]] %s2055_s9 }
   0x7   :  { %2077 = sst [smem:[#allocation35_spill]] %s2056_s10 }
   0x8   :  { %16 = vsyncpa [#allocation5], 0 }
   0x9   :  { %18 = vsyncpa [#allocation5 + $0x1], 0 }
   0xa   :  { %19 = vsyncpa [#allocation8], 0 }
   0xb   :  { %21 = vsyncpa [#allocation8 + $0x1], 0 }
   0xc   :  { %22 = vsyncpa [#allocation11], 0 }
   0xd   :  { %23 = vsyncpa [#allocation14], 0 }
   0xe   :  { %24 = vsyncpa [#allocation6], 0 }
   0xf   :  { %26 = vsyncpa [#allocation6 + $0x1], 0  ;;  %s1766_s17 = smov 0   ;;  %s1768_s18 = smov 0  }
  0x10   :  { %s1770_s19 = smov 0   ;;  %s1772_s20 = smov 0  }
  0x11   :  { %s1774_s21 = smov 0   ;;  %s1776_s22 = smov 0  }
  0x12 LB: > { %2078 = sst [smem:[#allocation22_spill]] %s1672_s17  ;;  %s1797_s23 = sadd.s32 4294967295, %s1692_s22   ;;  %s1692_s22 = sphi %s1776_s22, %s32_s22   ;;  %s1688_s21 = sphi %s1774_s21, %s2114_s21   ;;  %s1684_s20 = sphi %s1772_s20, %s2109_s20   ;;  %s1680_s19 = sphi %s1770_s19, %s2113_s19   ;;  %s1676_s18 = sphi %s1768_s18, %s2112_s18   ;;  %s1672_s17 = sphi %s1766_s17, %s2111_s17  }
  0x13   : > { %2079 = sst [smem:[#allocation23_spill]] %s1688_s21  ;;  %p1206_p0 = scmp.ge.s32.totalorder %s1692_s22, 1 }
  0x14   : > { %2080 = sst [smem:[#allocation24_spill]] %s1692_s22  ;;  %p67_p1 = scmp.eq.s32.totalorder %s1797_s23, 0 }
  0x15   : > { %p325_p2 = scmp.lt.s32.totalorder %s1692_s22, 3  ;;  %s2081_s3 = sld [smem:[#allocation31_spill]] }
  0x16   : > { %s1694_s28 = smov [#allocation10]   ;;  %p1211_p6 = scmp.ge.s32.totalorder %s1692_s22, 2 }
  0x17   : > { %p1805_p3 = pnand %p1206_p0, %p325_p2  ;;  %s338_s29 = sshll.u32 %s1694_s28, 4  ;;  %s339_s29 = int_to_ptr.vmem [resolvable:$true] %s338_s29 }
  0x18   : > { %s2084_s7 = sld [smem:[#allocation33_spill]]  ;;  %s2058_s15 = smov 128  }
  0x19   : > { %p1271_p4 = pneg %p1805_p3  ;;  %s2060_s16 = smov 8  }
  0x1a   : > { %s1697_s24 = smov [#allocation13]   ;;  %s1205_s28 = sadd.s32 4294967294, %s1692_s22  }
  0x1b   : > { %s336_s26 = sshll.u32 %s2081_s3, 4  ;;  %p1813_p5 = pnand %p1271_p4, %p67_p1  ;;  %s337_s26 = int_to_ptr.hbm [resolvable:$true] %s336_s26 }
  0x1c   : > { %s372_s25 = sshll.u32 %s1697_s24, 4  ;;  %s44_s12 = sadd.s32 1, %s1688_s21  ;;  %s373_s25 = int_to_ptr.vmem [resolvable:$true] %s372_s25 }
  0x1d   : > { %1274 = dma.hbm_to_vmem [thread:$0]  (!%p1813_p5), %s337_s26, 512, %s339_s29, [#allocation11], %s2058_s15, %s2058_s15, %s2060_s16  }
  0x1e   : > { %s370_s14 = sshll.u32 %s2084_s7, 4  ;;  %p46_p7 = scmp.ge.s32.totalorder %s44_s12, 2  ;;  %s371_s14 = int_to_ptr.hbm [resolvable:$true] %s370_s14 }
  0x1f   : > { %1280 = dma.hbm_to_vmem [thread:$0]  (!%p1813_p5), %s371_s14, 512, %s373_s25, [#allocation14], %s2058_s15, %s2058_s15, %s2060_s16  }
  0x20   : > { %s53_s13 = sadd.s32 1, %s1680_s19  ;;  %p60_p8 = scmp.ne.s32.totalorder %s1680_s19, %s1676_s18 }
  0x21   : > { %p61_p9 = scmp.eq.s32.totalorder %s1692_s22, 0  ;;  %s2116_s12 = smov (%p46_p7, %s44_s12), 0 }
  0x22   : > { %2085 = sst [smem:[#allocation25_spill]] %s2116_s12  ;;  %p66_p11 = scmp.ne.s32.totalorder %s1676_s18, %s1672_s17 }
  0x23   : > { %p1839_p10 = por %p61_p9, %p60_p8  ;;  %s48_s29 = ssub.s32 %s1688_s21, %s2116_s12 }
  0x24   : > { %p312_p12 = scmp.eq.s32.totalorder %s1797_s23, 1  ;;  %p51_p13 = scmp.eq.s32.totalorder %s48_s29, 0 }
  0x25   : > { %p1850_p0 = por %p67_p1, %p66_p11  ;;  %p318_p4 = scmp.eq.s32.totalorder %s1205_s28, 1 }
  0x26   : > { %p1854_p2 = por %p312_p12, %p60_p8  ;;  %p1302_p9 = scmp.lt.s32.totalorder %s1692_s22, 2 }
  0x27   : > { %s1859_s25 = scalar_select %p51_p13, %s1680_s19, %s53_s13  }
  0x28   : > { %s2088_s24 = scalar_select %p1854_p2, 1, 0 }
  0x29   : > { %2090 = sst [smem:[#allocation27_spill]] %s1859_s25  ;;  %p1861_p7 = por %p318_p4, %p66_p11 }
  0x2a   : > { %2089 = sst [smem:[#allocation26_spill]] %s2088_s24  ;;  %s2066_s16 = sand.u32 1, %s1680_s19  }
  0x2b   : > { %s2091_s15 = scalar_select %p1861_p7, 1, 0 }
  0x2c   : > { %s1868_s3 = sshll.u32 %s1688_s21, 3  ;;  %s1872_s29 = sshll.u32 %s2066_s16, 3 }
  0x2d   : > { %2092 = sst [smem:[#allocation28_spill]] %s2091_s15  ;;  %p1876_p8 = pnand %p1302_p9, %p1839_p10 }
  0x2e   : > { %s426_s28 = sand.u32 1, %s1692_s22   ;;  %s2094_s1 = sld [smem:[#allocation30_spill]] }
  0x2f   : > { %s430_s15 = scalar_lea.vmem [#allocation7], %s1872_s29  ;;  %s2095_s5 = sld [smem:[#allocation32_spill]] }
  0x30   : > { %s438_s21 = sshll.u32 %s430_s15, 4  ;;  %s427_s24 = scalar_lea.sflag [#allocation8], %s426_s28  ;;  %s439_s21 = int_to_ptr.vmem [resolvable:$true] %s438_s21 }
  0x31   : > { %s1698_s22 = smov [#allocation12]   ;;  %s2096_s9 = sld [smem:[#allocation34_spill]] }
  0x32   : > { %s355_s12 = sshll.u32 %s1698_s22, 4  ;;  %s2098_s16 = smov 128   ;;  %s356_s12 = int_to_ptr.vmem [resolvable:$true] %s355_s12 }
  0x33   : > { %s1699_s28 = smov [#allocation15]   ;;  %s2099_s0 = sld [smem:[#allocation29_spill]] }
  0x34   : > { %s434_s25 = scalar_lea.hbm %s2094_s1, %s1868_s3  ;;  %s410_s13 = scalar_lea.vmem [#allocation4], %s1872_s29 }
  0x35   : > { %s436_s17 = sshll.u32 %s434_s25, 4  ;;  %s353_s10 = sshll.u32 %s2095_s5, 4  ;;  %s437_s17 = int_to_ptr.hbm [resolvable:$true] %s436_s17  ;;  %s354_s10 = int_to_ptr.hbm [resolvable:$true] %s353_s10 }
  0x36   : > { %1290 = dma.hbm_to_vmem [thread:$0]  (!%p1876_p8), %s437_s17, 128, %s439_s21, %s427_s24  }
  0x37   : > { %s387_s15 = sshll.u32 %s2096_s9, 4  ;;  %s2097_s25 = smov 8   ;;  %s388_s15 = int_to_ptr.hbm [resolvable:$true] %s387_s15 }
  0x38   : > { %1277 = dma.hbm_to_vmem [thread:$0]  (!%p1813_p5), %s354_s10, 512, %s356_s12, [#allocation11], %s2098_s16, %s2098_s16, %s2097_s25  }
  0x39   : > { %s389_s17 = sshll.u32 %s1699_s28, 4  ;;  %s415_s22 = scalar_lea.hbm %s2099_s0, %s1868_s3  ;;  %s390_s17 = int_to_ptr.vmem [resolvable:$true] %s389_s17 }
  0x3a   : > { %1283 = dma.hbm_to_vmem [thread:$0]  (!%p1813_p5), %s388_s15, 512, %s390_s17, [#allocation14], %s2098_s16, %s2098_s16, %s2097_s25  }
  0x3b   : > { %s417_s1 = sshll.u32 %s415_s22, 4  ;;  %s419_s5 = sshll.u32 %s410_s13, 4  ;;  %s418_s1 = int_to_ptr.hbm [resolvable:$true] %s417_s1  ;;  %s420_s5 = int_to_ptr.vmem [resolvable:$true] %s419_s5 }
  0x3c   : > { %s2100_s9 = sand.u32 1, %s1680_s19   ;;  %s453_s21 = scalar_lea.hbm %s2048_s2, %s1868_s3 }
  0x3d   : > { %s407_s10 = scalar_lea.sflag [#allocation5], %s2100_s9  ;;  %s455_s26 = sshll.u32 %s453_s21, 4  ;;  %s456_s26 = int_to_ptr.hbm [resolvable:$true] %s455_s26 }
  0x3e   : > { %1287 = dma.hbm_to_vmem [thread:$0]  (!%p1876_p8), %s418_s1, 128, %s420_s5, %s407_s10  }
  0x3f   : > { %s449_s0 = scalar_lea.vmem [#allocation9], %s1872_s29  ;;  %466 = sbr.rel (%p1805_p3) target bundleno = 994 (0x3e2), region = 64 }
  0x40   : > { %s457_s30 = sshll.u32 %s449_s0, 4  ;;  %s1923_s15 = sand.u32 (!%p1805_p3), 1, %s1676_s18   ;;  %s458_s30 = int_to_ptr.vmem [resolvable:$true] %s457_s30 }
  0x41   : > { %1293 = dma.hbm_to_vmem [thread:$0]  (!%p1876_p8), %s456_s26, 128, %s458_s30, %s427_s24  }
  0x42   : > { %s1926_s5 = sshll.u32 (!%p1805_p3), %s1923_s15, 3  ;;  %s469_s3 = scalar_lea.sflag (!%p1805_p3), [#allocation5], %s1923_s15 }
  0x43   : > { %s472_s9 = scalar_lea.vmem (!%p1805_p3), [#allocation4], %s1926_s5 }
  0x44   : > { %1651 = dma.done.wait (%p1850_p0), %s469_s3, 128  }
  0x45   : > { %1653 = vsyncadd (%p1850_p0), %s469_s3, 4294967168  ;;  %s478_s0 = sand.u32 1, %s1797_s23   ;;  %s482_s27 = scalar_lea.vmem [#allocation7], %s1926_s5 }
  0x46   : > { %s479_s7 = scalar_lea.sflag [#allocation8], %s478_s0 }
  0x47   : > { %1655 = dma.done.wait (%p1850_p0), %s479_s7, 256  }
  0x48   : > { %1657 = vsyncadd (%p1850_p0), %s479_s7, 4294967040  ;;  %s492_s24 = scalar_lea.vmem [#allocation9], %s1926_s5 }
  0x49   : > { %1659 = dma.done.wait (%p67_p1), [#allocation11], 1024  }
  0x4a   : > { %1661 = vsyncadd (%p67_p1), [#allocation11], 4294966272 }
  0x4b   : > { %1663 = dma.done.wait (%p67_p1), [#allocation14], 1024  }
  0x4c   : > { %1665 = vsyncadd (%p67_p1), [#allocation14], 4294966272  ;;  %v570_v0 = vld [vmem:[#allocation12 + $0x18] sm:$0xff]  ;;  %v569_v1 = vld [vmem:[#allocation12 + $0x10] sm:$0xff]  ;;  %vm575_vm0 = vcmask 261120   ;;  %s1700_s16 = smov 112  }
  0x4d   : > { %v637_v2 = vld [vmem:[#allocation10 + $0x18] sm:$0xff]  ;;  %591 = vmatpush.msra.mxu0 %v570_v0  ;;  %v636_v3 = vld [vmem:[#allocation10 + $0x10] sm:$0xff]  ;;  %v568_v4 = vld [vmem:[#allocation12 + $0x8] sm:$0xff]  ;;  %vm692_vm1 = vcmask 64512   ;;  %s1701_s17 = smov 120   ;;  %s1702_s22 = smov 104  }
  0x4e   : > { %658 = vmatpush.msra.mxu2 %v637_v2  ;;  %v635_v5 = vld [vmem:[#allocation10 + $0x8] sm:$0xff]  ;;  %v567_v6 = vld [vmem:[#allocation12] sm:$0xff]  ;;  %v633_v9 = vld [vmem:[%s472_s9] sm:$0xff]  ;;  %s1703_s10 = smov 24   ;;  %s1704_s12 = smov 8  }
  0x4f   : > { %592 = vmatpush.msra.mxu0 %v569_v1  ;;  %v634_v7 = vld [vmem:[#allocation10] sm:$0xff]  ;;  %v604_v17 = vld [vmem:[#allocation13 + $0x18] sm:$0xff]  ;;  %v603_v18 = vld [vmem:[#allocation13 + $0x10] sm:$0xff]  ;;  %s1705_s28 = smov 16   ;;  %s1244_s21 = sshll.u32 %s1684_s20, 3 }
  0x50   : > { %659 = vmatpush.msra.mxu2 %v636_v3  ;;  %v566_v8 = vld [vmem:[%s482_s27] sm:$0xff]  ;;  %624 = vmatpush.msra.mxu1 %v604_v17  ;;  %v600_v21 = vld [vmem:[%s492_s24] sm:$0xff]  ;;  %s1038_s9 = scalar_lea.hbm %s2057_s11, %s1244_s21  ;;  %s2104_s27 = sld [smem:[#allocation35_spill]] }
  0x51   : > { %593 = vmatpush.msra.mxu0 %v568_v4  ;;  %v1368_v10 = vld [vmem:[%s2052_s6] ss:$0 sm:$0xff]  ;;  %v602_v19 = vld [vmem:[#allocation13 + $0x8] sm:$0xff]  ;;  %s561_s24 = scalar_lea.vmem [#allocation16], %s1926_s5  ;;  %s1042_s14 = sshll.u32 %s1038_s9, 4  ;;  %s1043_s14 = int_to_ptr.hbm [resolvable:$true] %s1042_s14 }
  0x52   : > { %660 = vmatpush.msra.mxu2 %v635_v5  ;;  %v1369_v13 = vld [vmem:[%s2050_s4] ss:$0 sm:$0xff]  ;;  %625 = vmatpush.msra.mxu1 %v603_v18  ;;  %s1040_s23 = sshll.u32 %s561_s24, 4  ;;  %s1027_s29 = scalar_lea.sflag [#allocation6], %s1923_s15  ;;  %s1041_s23 = int_to_ptr.vmem [resolvable:$true] %s1040_s23 }
  0x53   : > { %594 = vmatpush.msra.mxu0 %v567_v6  ;;  %v601_v20 = vld [vmem:[#allocation13] sm:$0xff]  ;;  %s1612_s20 = sshra.s32 %s1043_s14, 4  ;;  %s1618_s5 = scalar_lea.hbm %s2057_s11, 16  ;;  %s1613_s20 = int_to_ptr.hbm [resolvable:$true] %s1612_s20 }
  0x54   : > { %661 = vmatpush.msra.mxu2 %v634_v7  ;;  %1227 = vmatmul.msk.f32.vlgmr.msra.gmra.mxu0 %vm575_vm0, %v566_v8  ;;  %v1370_v28 = vld [vmem:[%s2054_s8] ss:$0 sm:$0xff]  ;;  %s1614_s25 = scalar_lea.hbm %s1613_s20, 8  ;;  %p1619_p10 = scmp.lt.s32.totalorder %s1613_s20, %s2057_s11 }
  0x55   : > { %1229 = vmatmul.msk.f32.vlgmr.msra.gmra.mxu2 %vm575_vm0, %v633_v9  ;;  %626 = vmatpush.msra.mxu1 %v602_v19  ;;  %p1615_p1 = scmp.ne.s32.totalorder %s1613_s20, %s1614_s25  ;;  %p1620_p11 = scmp.lt.s32.totalorder %s1618_s5, %s1614_s25 }
  0x57   : > { %627 = vmatpush.msra.mxu1 %v601_v20  ;;  %p1616_p3 = pnand %p1615_p1, %p1854_p2  ;;  %p1621_p12 = por %p1620_p11, %p1619_p10 }
  0x58   : > { %1228 = vmatmul.msk.f32.vlgmr.msra.gmra.mxu1 %vm575_vm0, %v600_v21 }
  0x59   : > { %p1617_p5 = pneg %p1616_p3 }
  0x5b   : > { %p1622_p13 = pnand %p1621_p12, %p1617_p5 }
  0xd1   : > { %v596_v11 = vpop.f32.mrf.mxu0 }
  0xd2   : > { %v597_v12 = vadd.f32 %v1368_v10, %v596_v11 }
  0xd4   : > { %599 = vst.msk [vmem:[#allocation2] sm:$0xff] %vm575_vm0, %v597_v12 }
  0xd5   : > { %v629_v29 = vpop.f32.mrf.mxu1 }
  0xd6   : > { %v630_v30 = vadd.f32 %v1370_v28, %v629_v29 }
  0xd8   : > { %v663_v14 = vpop.f32.mrf.mxu2  ;;  %632 = vst.msk [vmem:[#allocation3] sm:$0xff] %vm575_vm0, %v630_v30 }
  0xd9   : > { %v664_v15 = vadd.f32 %v1369_v13, %v663_v14 }
  0xdb   : > { %671 = vrot.lane.b32.xlu2 %v664_v15, %s1700_s16  ;;  %v666_v16 = vld [vmem:[#allocation2] sm:$0xff] }
  0xdc   : > { %678 = vrot.lane.b32.xlu1 %v666_v16, %s1700_s16  ;;  %676 = vrot.lane.b32.xlu0 %v666_v16, %s1701_s17 }
  0xdd   : > { %1230 = vmatpush.xpose.msk.msra.mxu3 %vm692_vm1, %v666_v16 }
  0xdf   : > { %v667_v31 = vld [vmem:[#allocation3] sm:$0xff] }
  0xe0   : > { %1231 = vmatmul.msk.f32.vlgmr.msra.gmra.mxu3 %vm692_vm1, %v664_v15  ;;  %843 = vmatpush.msrb.mxu2 %v667_v31 }
  0xe3   : > { %673 = vrot.lane.b32.xlu2 %v664_v15, %s1702_s22 }
  0xe4   : > { %680 = vrot.lane.b32.xlu1 %v666_v16, %s1702_s22  ;;  %669 = vrot.lane.b32.xlu0 %v664_v15, %s1701_s17 }
 0x135   : > { %v672_v24 = vpop.permute.xlu2 %671 }
 0x13d   : > { %v674_v27 = vpop.permute.xlu2 %673 }
 0x14e   : > { %v679_v22 = vpop.permute.xlu1 %678  ;;  %v677_v23 = vpop.permute.xlu0 %676 }
 0x14f   : > { %1232 = vmatpush.xpose.msk.msrb.mxu3 %vm692_vm1, %v677_v23  ;;  %1234 = vmatpush.xpose.msk.msrb.mxu0 %vm692_vm1, %v679_v22 }
 0x152   : > { %1235 = vmatmul.msk.f32.vlgmr.msrb.gmra.mxu0 %vm692_vm1, %v672_v24 }
 0x156   : > { %v681_v25 = vpop.permute.xlu1 %680  ;;  %v670_v26 = vpop.permute.xlu0 %669 }
 0x157   : > { %1233 = vmatmul.msk.f32.vlgmr.msrb.gmra.mxu3 %vm692_vm1, %v670_v26  ;;  %1236 = vmatpush.xpose.msk.msrb.mxu1 %vm692_vm1, %v681_v25 }
 0x15a   : > { %1237 = vmatmul.msk.f32.vlgmr.msrb.gmra.mxu1 %vm692_vm1, %v674_v27 }
 0x163   : > { %v714_v34 = vpop.f32.mrf.mxu3 }
 0x164   : > { %v789_v39 = vsel %vm692_vm1, %v714_v34, -inf }
 0x1cf   : > { %v762_v32 = vpop.f32.mrf.mxu0 }
 0x1d0   : > { %v795_v33 = vsel %vm692_vm1, %v762_v32, -inf }
 0x1d1   : > { %796 = vmax.xlane.f32.xlu1 %v795_v33 }
 0x1d7   : > { %v786_v35 = vpop.f32.mrf.mxu1 }
 0x1d8   : > { %v798_v36 = vsel %vm692_vm1, %v786_v35, -inf }
 0x1d9   : > { %799 = vmax.xlane.f32.xlu2 %v798_v36 }
 0x1da   : > { %v738_v37 = vpop.f32.mrf.mxu3 }
 0x1db   : > { %v792_v38 = vsel %vm692_vm1, %v738_v37, -inf }
 0x1dc   : > { %793 = vmax.xlane.f32.xlu0 %v792_v38 }
 0x1ea   : > { %689 = vrot.lane.b32.xlu1 %v667_v31, %s1702_s22 }
 0x1f0   : > { %686 = vrot.lane.b32.xlu0 %v667_v31, %s1700_s16 }
 0x1f1   : > { %683 = vrot.lane.b32.xlu2 %v667_v31, %s1701_s17 }
 0x21a   : > { %790 = vmax.xlane.f32.xlu0 %v789_v39  ;;  %v997_v39 = vld [vmem:[#allocation15 + $0x18] sm:$0xff] }
 0x21b   : > { %1017 = vmatpush.msra.mxu2 %v997_v39 }
 0x244   : > { %v797_v40 = vpop.xlane.xlu1 %796 }
 0x245   : > { %v803_v41 = vsub.f32 %v762_v32, %v797_v40  ;;  %v996_v40 = vld [vmem:[#allocation15 + $0x10] sm:$0xff] }
 0x246   : > { %1018 = vmatpush.msra.mxu2 %v996_v40 }
 0x247   : > { %v809_v42 = vmul.f32 1.442695, %v803_v41 }
 0x249   : > { %1372 = vpow2.f32 %v809_v42  ;;  %v995_v42 = vld [vmem:[#allocation15 + $0x8] sm:$0xff] }
 0x24a   : > { %1019 = vmatpush.msra.mxu2 %v995_v42 }
 0x24c   : > { %v800_v43 = vpop.xlane.xlu2 %799 }
 0x24d   : > { %v804_v44 = vsub.f32 %v786_v35, %v800_v43  ;;  %v994_v43 = vld [vmem:[#allocation15] sm:$0xff] }
 0x24e   : > { %1020 = vmatpush.msra.mxu2 %v994_v43 }
 0x24f   : > { %v1373_v45 = vpop.eup %1372  ;;  %v811_v46 = vmul.f32 1.442695, %v804_v44  ;;  %v794_v47 = vpop.xlane.xlu0 %793 }
 0x250   : > { %v802_v48 = vsub.f32 %v738_v37, %v794_v47  ;;  %v819_v49 = vsel %vm692_vm1, %v1373_v45, 0.0 }
 0x251   : > { %1374 = vpow2.f32 %v811_v46  ;;  %820 = vadd.xlane.f32.xlu1 %v819_v49 }
 0x252   : > { %v807_v50 = vmul.f32 1.442695, %v802_v48 }
 0x254   : > { %1376 = vpow2.f32 %v807_v50  ;;  %v684_v51 = vpop.permute.xlu2 %683 }
 0x255   : > { %866 = vmatpush.msra.mxu3 %v684_v51 }
 0x257   : > { %v1375_v52 = vpop.eup %1374 }
 0x258   : > { %v822_v53 = vsel %vm692_vm1, %v1375_v52, 0.0 }
 0x259   : > { %823 = vadd.xlane.f32.xlu0 %v822_v53 }
 0x25a   : > { %v1377_v54 = vpop.eup %1376 }
 0x25b   : > { %1239 = vmatmul.msk.f32.vlgmr.msra.gmra.mxu3 %vm692_vm1, %v1377_v54  ;;  %v816_v55 = vsel %vm692_vm1, %v1377_v54, 0.0 }
 0x25c   : > { %v690_v56 = vpop.permute.xlu1 %689  ;;  %817 = vadd.xlane.f32.xlu2 %v816_v55 }
 0x25d   : > { %912 = vmatpush.msra.mxu1 %v690_v56 }
 0x25e   : > { %1241 = vmatmul.msk.f32.vlgmr.msra.gmra.mxu1 %vm692_vm1, %v1375_v52 }
 0x262   : > { %v687_v57 = vpop.permute.xlu0 %686 }
 0x263   : > { %889 = vmatpush.msra.mxu0 %v687_v57 }
 0x264   : > { %1240 = vmatmul.msk.f32.vlgmr.msra.gmra.mxu0 %vm692_vm1, %v1373_v45 }
 0x28d   : > { %v791_v58 = vpop.xlane.xlu0 %790 }
 0x28e   : > { %v801_v59 = vsub.f32 %v714_v34, %v791_v58 }
 0x290   : > { %v805_v60 = vmul.f32 1.442695, %v801_v59 }
 0x292   : > { %1378 = vpow2.f32 %v805_v60 }
 0x298   : > { %v1379_v61 = vpop.eup %1378 }
 0x299   : > { %1238 = vmatmul.msk.f32.vlgmr.msrb.gmra.mxu2 %vm692_vm1, %v1379_v61  ;;  %v813_v62 = vsel %vm692_vm1, %v1379_v61, 0.0 }
 0x29a   : > { %814 = vadd.xlane.f32.xlu2 %v813_v62  ;;  %v1371_v62 = vld [vmem:[%s2104_s27] ss:$0 sm:$0xff] }
 0x2c4   : > { %v821_v63 = vpop.xlane.xlu1 %820 }
 0x2c5   : > { %1380 = vrcp.f32 %v821_v63  ;;  %v956_v15 = vand.u32 2147483648, %v821_v63  ;;  %vm950_vm8 = vweird.f32 %v821_v63  ;;  %v954_v23 = vand.u32 2147483647, %v821_v63 }
 0x2c7   : > { %v957_v32 = vor.u32 1.1754944e-38, %v956_v15  ;;  %vm955_vm13 = vcmp.eq.f32.partialorder %v954_v23, 8.507059e+37 }
 0x2cb   : > { %v1381_v0 = vpop.eup %1380 }
 0x2cc   : > { %v824_v1 = vpop.xlane.xlu0 %823  ;;  %v946_v2 = vmul.f32 %v1381_v0, %v821_v63  ;;  %vm951_vm3 = vweird.f32 %v1381_v0 }
 0x2cd   : > { %1382 = vrcp.f32 %v824_v1  ;;  %v970_v11 = vand.u32 2147483648, %v824_v1  ;;  %v968_v13 = vand.u32 2147483647, %v824_v1  ;;  %vm964_vm4 = vweird.f32 %v824_v1  ;;  %vm1995_vm10 = vmor %vm950_vm8, %vm951_vm3 }
 0x2ce   : > { %v947_v4 = vsub.f32 1.0, %v946_v2 }
 0x2cf   : > { %v818_v3 = vpop.xlane.xlu2 %817  ;;  %v971_v19 = vor.u32 1.1754944e-38, %v970_v11  ;;  %vm969_vm7 = vcmp.eq.f32.partialorder %v968_v13, 8.507059e+37 }
 0x2d0   : > { %1384 = vrcp.f32 %v818_v3  ;;  %v948_v9 = vmul.f32 %v1381_v0, %v947_v4  ;;  %v942_v17 = vand.u32 2147483648, %v818_v3  ;;  %v940_v21 = vand.u32 2147483647, %v818_v3 }
 0x2d1   : > { %vm936_vm9 = vweird.f32 %v818_v3 }
 0x2d2   : > { %v949_v18 = vadd.f32 %v1381_v0, %v948_v9  ;;  %v943_v29 = vor.u32 1.1754944e-38, %v942_v17  ;;  %vm941_vm12 = vcmp.eq.f32.partialorder %v940_v21, 8.507059e+37 }
 0x2d3   : > { %v1383_v5 = vpop.eup %1382 }
 0x2d4   : > { %v960_v6 = vmul.f32 %v1383_v5, %v824_v1  ;;  %vm965_vm2 = vweird.f32 %v1383_v5  ;;  %v953_v30 = vsel %vm1995_vm10, %v1381_v0, %v949_v18 }
 0x2d5   : > { %vm966_vm5 = vmor %vm964_vm4, %vm965_vm2  ;;  %v958_v37 = vsel %vm955_vm13, %v957_v32, %v953_v30  ;;  %vm990_vm4 = vcmask 130048  }
 0x2d6   : > { %v1385_v7 = vpop.eup %1384  ;;  %v961_v8 = vsub.f32 1.0, %v960_v6 }
 0x2d7   : > { %v932_v10 = vmul.f32 %v1385_v7, %v818_v3  ;;  %vm937_vm6 = vweird.f32 %v1385_v7 }
 0x2d8   : > { %v962_v12 = vmul.f32 %v1383_v5, %v961_v8  ;;  %vm938_vm11 = vmor %vm936_vm9, %vm937_vm6 }
 0x2d9   : > { %v933_v14 = vsub.f32 1.0, %v932_v10 }
 0x2da   : > { %v963_v16 = vadd.f32 %v1383_v5, %v962_v12 }
 0x2db   : > { %v934_v20 = vmul.f32 %v1385_v7, %v933_v14  ;;  %v914_v24 = vpop.f32.mrf.mxu1 }
 0x2dc   : > { %v967_v22 = vsel %vm966_vm5, %v1383_v5, %v963_v16  ;;  %vm992_vm5 = vcmask 195584  }
 0x2dd   : > { %v972_v25 = vsel %vm969_vm7, %v971_v19, %v967_v22  ;;  %v935_v26 = vadd.f32 %v1385_v7, %v934_v20 }
 0x2de   : > { %v976_v28 = vmul.f32 %v972_v25, %v914_v24  ;;  %v868_v33 = vpop.f32.mrf.mxu3 }
 0x2df   : > { %v939_v31 = vsel %vm938_vm11, %v1385_v7, %v935_v26 }
 0x2e0   : > { %v944_v34 = vsel %vm941_vm12, %v943_v29, %v939_v31  ;;  %986 = vrot.lane.b32.xlu2 %v976_v28, %s1703_s10 }
 0x2e1   : > { %v974_v35 = vmul.f32 %v944_v34, %v868_v33  ;;  %v891_v36 = vpop.f32.mrf.mxu0 }
 0x2e2   : > { %v975_v38 = vmul.f32 %v958_v37, %v891_v36 }
 0x2e3   : > { %978 = vrot.lane.b32.xlu1 %v974_v35, %s1704_s12 }
 0x2e4   : > { %982 = vrot.lane.b32.xlu0 %v975_v38, %s1705_s28 }
 0x30d   : > { %v815_v41 = vpop.xlane.xlu2 %814 }
 0x30e   : > { %1386 = vrcp.f32 %v815_v41  ;;  %v928_v49 = vand.u32 2147483648, %v815_v41  ;;  %vm922_vm15 = vweird.f32 %v815_v41  ;;  %v926_v50 = vand.u32 2147483647, %v815_v41 }
 0x310   : > { %v929_v52 = vor.u32 1.1754944e-38, %v928_v49  ;;  %vm927_vm3 = vcmp.eq.f32.partialorder %v926_v50, 8.507059e+37 }
 0x314   : > { %v1387_v44 = vpop.eup %1386 }
 0x315   : > { %v918_v45 = vmul.f32 %v1387_v44, %v815_v41  ;;  %vm923_vm14 = vweird.f32 %v1387_v44 }
 0x316   : > { %vm924_vm2 = vmor %vm922_vm15, %vm923_vm14 }
 0x317   : > { %v919_v46 = vsub.f32 1.0, %v918_v45 }
 0x319   : > { %v920_v47 = vmul.f32 %v1387_v44, %v919_v46 }
 0x31b   : > { %v921_v48 = vadd.f32 %v1387_v44, %v920_v47 }
 0x31c   : > { %v845_v54 = vpop.f32.mrf.mxu2 }
 0x31d   : > { %v925_v51 = vsel %vm924_vm2, %v1387_v44, %v921_v48 }
 0x31e   : > { %v930_v53 = vsel %vm927_vm3, %v929_v52, %v925_v51 }
 0x31f   : > { %v973_v55 = vmul.f32 %v930_v53, %v845_v54 }
 0x33a   : > { %v987_v59 = vpop.permute.xlu2 %986 }
 0x355   : > { %v979_v56 = vpop.permute.xlu1 %978 }
 0x356   : > { %v989_v57 = vsel %vm692_vm1, %v973_v55, %v979_v56  ;;  %v983_v58 = vpop.permute.xlu0 %982 }
 0x357   : > { %v991_v60 = vsel %vm990_vm4, %v989_v57, %v983_v58 }
 0x358   : > { %v993_v61 = vsel %vm992_vm5, %v991_v60, %v987_v59 }
 0x359   : > { %1242 = vmatmul.msk.f32.vlgmr.msra.gmra.mxu2 %vm575_vm0, %v993_v61 }
 0x3dc   : > { %v1022_v63 = vpop.f32.mrf.mxu2 }
 0x3dd   : > { %v1023_v0 = vadd.f32 %v1371_v62, %v1022_v63 }
 0x3df   : > { %1025 = vst.msk [vmem:[%s561_s24] sm:$0xff] %vm575_vm0, %v1023_v0 }
 0x3e0   : > { %1625 = shalt.err (!%p1622_p13)
}
 0x3e1   : > { %1269 = dma.vmem_to_hbm [thread:$0]  (%p1854_p2), %s1041_s23, 128, %s1043_s14, %s1027_s29  }
 0x3e2 PF: > { %s2105_s15 = sld [smem:[#allocation22_spill]]  ;;  %p1295_p0 = pnand %p1211_p6, %p1861_p7 }
 0x3e3   : > { %s2107_s10 = sld [smem:[#allocation24_spill]] }
 0x3e4   : > { %p1296_p4 = pneg %p1295_p0 }
 0x3e8   : > { %s1054_s12 = sand.u32 1, %s2105_s15  }
 0x3e9   : > { %s1055_s28 = scalar_lea.sflag [#allocation6], %s1054_s12 }
 0x3ea   : > { %1667 = dma.done.wait (%p1296_p4), %s1055_s28, 128  }
 0x3eb   : > { %1669 = vsyncadd (%p1296_p4), %s1055_s28, 4294967168  ;;  %s32_s22 = sadd.s32 1, %s2107_s10   ;;  %s2108_s21 = sld [smem:[#allocation27_spill]] }
 0x3ec   : > { %p29_p9 = scmp.ge.s32.totalorder %s32_s22, 4   ;;  %s2109_s20 = sld [smem:[#allocation23_spill]] }
 0x3ed   : > { %s2110_s26 = sld [smem:[#allocation25_spill]]  ;;  %s2111_s17 = smov %s1676_s18 }
 0x3ee   : > { %s2112_s18 = smov %s1680_s19 }
 0x3ef   :  { %31 = sbr.rel (!%p29_p9) target bundleno = 18 (0x12), region = 153 }
 0x3f1   : > { %s2113_s19 = smov %s2108_s21 }
 0x3f3   : > { %s2114_s21 = smov %s2110_s26 }
 0x3f4   :  { %1061 = vsyncpa [#allocation5], 1 }
 0x3f5   :  { %1063 = vsyncpa [#allocation5 + $0x1], 1 }
 0x3f6   :  { %1064 = vsyncpa [#allocation8], 1 }
 0x3f7   :  { %1066 = vsyncpa [#allocation8 + $0x1], 1 }
 0x3f8   :  { %1067 = vsyncpa [#allocation11], 1 }
 0x3f9   :  { %1068 = vsyncpa [#allocation14], 1 }
 0x3fa   :  { %1069 = vsyncpa [#allocation6], 1 }
 0x3fb   :  { %1071 = vsyncpa [#allocation6 + $0x1], 1 }

</bundles_post_ra>
